<compile_context>
chip_gen: v6e
topology: v6e:2x2x1
jax: 0.10.0
libtpu: 0.0.40
codegen_flags: <defaults>
</compile_context>

<pallas_src>
import jax
import jax.numpy as jnp
from jax.experimental import pallas as pl
from jax.experimental.pallas import tpu as pltpu


# ---------------- packed parameter slab layout (f32, 128 lanes, 8-aligned rows) --------
# rows  0:32 , cols 0:64 -> W2^T (32, 64)
# rows 32:48 , cols 0:32 -> W3^T (16, 32)
# rows 48:112, col  0    -> W1^T (64, 1)
# rows 48:112, col  1    -> b1   (64, 1)
# rows 48:80 , col  2    -> b2   (32, 1)
# rows 48:64 , col  3    -> b3   (16, 1)
# rows 48:64 , col  4    -> W4   (16, 1)
# row  48    , col  5    -> b4   (1, 1)
_P_ROWS = 112
_LANES = 128


def _gnn_kernel(x_ref, a_ref, p_ref, o_ref):
    """x_ref: (1, 1, L) f32 packed node features (G graphs along lanes);
    a_ref: (L, L) bf16 block-diagonal A_norm^T (resident, constant index_map);
    p_ref: (112, 128) f32 packed parameter slab; o_ref: (1, 1, L) f32 output."""
    a = a_ref[...]                                            # (L, L) bf16

    def prop(g):                                              # (F, L) f32 -> (F, L) f32
        # bf16 operands, f32 accumulation on the MXU.
        return jnp.dot(g.astype(jnp.bfloat16), a, preferred_element_type=jnp.float32)

    # ---- parameters: static slices of the packed slab --------------------------------
    w2t = p_ref[0:32, 0:64].astype(jnp.bfloat16)              # (32, 64)
    w3t = p_ref[32:48, 0:32].astype(jnp.bfloat16)             # (16, 32)
    w1t = p_ref[48:112, 0:1]                                  # (64, 1) f32
    b1 = p_ref[48:112, 1:2]                                   # (64, 1)
    b2 = p_ref[48:80, 2:3]                                    # (32, 1)
    b3 = p_ref[48:64, 3:4]                                    # (16, 1)
    w4 = p_ref[48:64, 4:5]                                    # (16, 1)
    b4 = p_ref[48:49, 5:6]                                    # (1, 1)

    x_row = x_ref[0]                                          # (1, L): nodes in lanes

    # layer 1 (in_dim == 1): propagate the width-1 signal first, then broadcast by W1.
    g = jnp.maximum(w1t * prop(x_row) + b1, 0.0)              # (64, L)
    # layer 2: 64 -> 32
    g = jnp.dot(w2t, g.astype(jnp.bfloat16), preferred_element_type=jnp.float32)  # (32, L)
    g = jnp.maximum(prop(g) + b2, 0.0)
    # layer 3: 32 -> 16
    g = jnp.dot(w3t, g.astype(jnp.bfloat16), preferred_element_type=jnp.float32)  # (16, L)
    g = jnp.maximum(prop(g) + b3, 0.0)
    # layer 4: 16 -> 1. Propagate the (16, L) tile on the MXU, then project 16 -> 1 with a
    # VPU multiply + sublane reduction -> lane-dense (1, L) store.
    q = jnp.sum(prop(g) * w4, axis=0, keepdims=True) + b4     # (1, L)
    o_ref[0] = q


def _gnn_pallas(x_packed, a_bd, param_slab):
    """x_packed: (B', 1, L) f32, a_bd: (L, L) bf16 block-diag A_norm^T, slab: (112,128)."""
    bsteps, _, lanes = x_packed.shape
    flops = bsteps * 2 * lanes * (lanes * (1 + 32 + 16 + 16) + (64 + 64 * 32 + 32 * 16 + 16))
    cost = pl.CostEstimate(
        flops=int(flops),
        transcendentals=0,
        bytes_accessed=int(8 * bsteps * lanes + 2 * lanes * lanes + 4 * _P_ROWS * _LANES),
    )
    return pl.pallas_call(
        _gnn_kernel,
        out_shape=jax.ShapeDtypeStruct((bsteps, 1, lanes), jnp.float32),
        grid=(bsteps,),
        in_specs=[
            pl.BlockSpec((1, 1, lanes), lambda i: (i, 0, 0)),        # per-step packed graphs
            pl.BlockSpec((lanes, lanes), lambda i: (0, 0)),          # A_norm^T: DMA'd once
            pl.BlockSpec((_P_ROWS, _LANES), lambda i: (0, 0)),       # shared param slab
        ],
        out_specs=pl.BlockSpec((1, 1, lanes), lambda i: (i, 0, 0)),
        compiler_params=pltpu.CompilerParams(
            dimension_semantics=("parallel",),            # megacore-safe: no scratch init
            vmem_limit_bytes=8 * 1024 * 1024,             # working set ~200 KiB; fits v7x easily
        ),
        cost_estimate=cost,
    )(x_packed, a_bd, param_slab)


def _graphs_per_step(n):
    """Pack G graphs along lanes when n < 128 so every store/vreg is lane-dense."""
    if n <= _LANES and _LANES % n == 0:
        return _LANES // n
    return 1


def _gcn_norm_adj_t(edge_index, n):
    """A_norm^T[src, dst] with self loops and D^{-1/2} folded in (tiny one-shot XLA op)."""
    src, dst = edge_index[0], edge_index[1]
    at = jnp.zeros((n, n), jnp.float32).at[src, dst].set(1.0)   # idempotent: dup edges = 1
    at = jnp.maximum(at, jnp.eye(n, dtype=jnp.float32))         # add remaining self loops
    d = jax.lax.rsqrt(jnp.sum(at, axis=0))                      # deg >= 1 (self loop)
    return at * d[:, None] * d[None, :]


@jax.jit
def gnn_qlearning_forward_batched(xb, edge_index, param_slab):
    """Batch of node-feature sets over one shared topology: xb (B, N) -> q (B, N)."""
    b, n = xb.shape
    g = _graphs_per_step(n)
    a_t = _gcn_norm_adj_t(edge_index.astype(jnp.int32), n)
    a_bd = jnp.kron(jnp.eye(g, dtype=jnp.float32), a_t).astype(jnp.bfloat16)
    b_pad = ((b + g - 1) // g) * g
    xb_f = xb.astype(jnp.float32)
    if b_pad != b:
        xb_f = jnp.pad(xb_f, ((0, b_pad - b), (0, 0)))
    x_packed = xb_f.reshape(b_pad // g, 1, g * n)               # G graphs concat along lanes
    out = _gnn_pallas(x_packed, a_bd, param_slab)
    return out.reshape(b_pad, n)[:b]


@jax.jit
def gnn_qlearning_forward(x, edge_index, param_slab):
    """Single graph, module interface: x (N, 1) -> q (N, 1)."""
    n = x.shape[0]
    q = gnn_qlearning_forward_batched(x.reshape(1, n), edge_index, param_slab)
    return q.reshape(n, 1)


# --------------------------------- parameters ------------------------------------------
def init_params(key):
    """Deterministic glorot-ish init. Weights: (in, out). Biases kept 2D (1, out)."""
    dims = [(1, 64), (64, 32), (32, 16), (16, 1)]
    params = []
    for i, (fi, fo) in enumerate(dims):
        kw = jax.random.fold_in(key, i)
        scale = jnp.sqrt(6.0 / (fi + fo))
        w = jax.random.uniform(kw, (fi, fo), jnp.float32, -scale, scale)
        b = jnp.zeros((1, fo), jnp.float32)
        params.append((w, b))
    return params


def pack_params(params):
    """Pack the 8 small tensors into a single (112, 128) f32 slab (one DMA)."""
    (w1, b1), (w2, b2), (w3, b3), (w4, b4) = params
    slab = jnp.zeros((_P_ROWS, _LANES), jnp.float32)
    slab = slab.at[0:32, 0:64].set(w2.T)
    slab = slab.at[32:48, 0:32].set(w3.T)
    slab = slab.at[48:112, 0:1].set(w1.reshape(64, 1))
    slab = slab.at[48:112, 1:2].set(b1.reshape(64, 1))
    slab = slab.at[48:80, 2:3].set(b2.reshape(32, 1))
    slab = slab.at[48:64, 3:4].set(b3.reshape(16, 1))
    slab = slab.at[48:64, 4:5].set(w4.reshape(16, 1))
    slab = slab.at[48:49, 5:6].set(b4.reshape(1, 1))
    return slab


# --------------------------------- plain-JAX reference (f32) ---------------------------
def gcn_normalized_adjacency(edge_index, num_nodes):
    src, dst = edge_index[0], edge_index[1]
    a = jnp.zeros((num_nodes, num_nodes), jnp.float32).at[dst, src].set(1.0)
    a_hat = jnp.maximum(a, jnp.eye(num_nodes, dtype=jnp.float32))
    d_inv_sqrt = 1.0 / jnp.sqrt(jnp.sum(a_hat, axis=1))
    return d_inv_sqrt[:, None] * a_hat * d_inv_sqrt[None, :]


def reference_forward(x, edge_index, params):
    a_norm = gcn_normalized_adjacency(edge_index, x.shape[0])
    h = x
    for i, (w, b) in enumerate(params):
        h = a_norm @ (h @ w) + b
        if i < len(params) - 1:
            h = jnp.maximum(h, 0.0)
    return h


if __name__ == "__main__":
    key = jax.random.PRNGKey(0)
    n_nodes = 16
    batch = 16   # -> 2 packed grid steps of 8 graphs each (keeps both v7x TCs busy)

    # undirected ring graph as COO edge_index [2, E] (both directions)
    idx = jnp.arange(n_nodes)
    src = jnp.concatenate([idx, (idx + 1) % n_nodes])
    dst = jnp.concatenate([(idx + 1) % n_nodes, idx])
    edge_index = jnp.stack([src, dst]).astype(jnp.int32)

    params = init_params(jax.random.fold_in(key, 200))
    slab = pack_params(params)

    # --- single graph (matches the PyTorch module: x is [N, 1]) ------------------------
    x = jax.random.normal(jax.random.fold_in(key, 100), (n_nodes, 1), jnp.float32)
    out = jax.block_until_ready(gnn_qlearning_forward(x, edge_index, slab))
    ref = reference_forward(x, edge_index, params)
    assert out.shape == (n_nodes, 1)
    # bf16 MXU operands (f32 accumulation) -> compare at a correspondingly looser tol.
    assert jnp.allclose(out, ref, atol=3e-2, rtol=3e-2), float(jnp.max(jnp.abs(out - ref)))

    # --- batched forward over the same topology (lane-packed, 'parallel' grid axis) ----
    xb = jax.random.normal(jax.random.fold_in(key, 300), (batch, n_nodes), jnp.float32)
    outb = jax.block_until_ready(gnn_qlearning_forward_batched(xb, edge_index, slab))
    refb = jnp.stack(
        [reference_forward(xb[i].reshape(n_nodes, 1), edge_index, params).reshape(n_nodes)
         for i in range(batch)])
    assert outb.shape == (batch, n_nodes)
    assert jnp.allclose(outb, refb, atol=3e-2, rtol=3e-2), float(jnp.max(jnp.abs(outb - refb)))

    print("KERNEL_OK")
</pallas_src>

<mosaic_0001>
module attributes {stable_mosaic.version = 11 : i64} {
  func.func @_gnn_kernel(%arg0: i32, %arg1: memref<1x1x128xf32, #tpu.memory_space<vmem>>, %arg2: memref<128x128xbf16, #tpu.memory_space<vmem>>, %arg3: memref<112x128xf32, #tpu.memory_space<vmem>>, %arg4: memref<1x1x128xf32, #tpu.memory_space<vmem>>) attributes {dimension_semantics = [#tpu.dimension_semantics<parallel>], iteration_bounds = array<i64: 1>, scalar_prefetch = 0 : i64, scratch_operands = 0 : i64, tpu.core_type = #tpu.core_type<tc>, window_params = [{transform_indices = @transform_0, window_bounds = array<i64: 1, 1, 128>}, {pipeline_mode = #tpu.pipeline_mode<synchronous>, transform_indices = @transform_1, window_bounds = array<i64: 128, 128>}, {pipeline_mode = #tpu.pipeline_mode<synchronous>, transform_indices = @transform_2, window_bounds = array<i64: 112, 128>}, {transform_indices = @transform_3, window_bounds = array<i64: 1, 1, 128>}]} {
    %c0 = arith.constant 0 : index
    %c0_0 = arith.constant 0 : index
    %0 = vector.load %arg2[%c0, %c0_0] : memref<128x128xbf16, #tpu.memory_space<vmem>>, vector<128x128xbf16>
    %c0_1 = arith.constant 0 : index
    %c0_2 = arith.constant 0 : index
    %1 = vector.load %arg3[%c0_1, %c0_2] : memref<112x128xf32, #tpu.memory_space<vmem>>, vector<32x64xf32>
    %2 = arith.truncf %1 : vector<32x64xf32> to vector<32x64xbf16>
    %c32 = arith.constant 32 : index
    %c0_3 = arith.constant 0 : index
    %3 = vector.load %arg3[%c32, %c0_3] : memref<112x128xf32, #tpu.memory_space<vmem>>, vector<16x32xf32>
    %4 = arith.truncf %3 : vector<16x32xf32> to vector<16x32xbf16>
    %c48 = arith.constant 48 : index
    %c0_4 = arith.constant 0 : index
    %5 = vector.load %arg3[%c48, %c0_4] : memref<112x128xf32, #tpu.memory_space<vmem>>, vector<64x1xf32>
    %c48_5 = arith.constant 48 : index
    %c1 = arith.constant 1 : index
    %6 = vector.load %arg3[%c48_5, %c1] : memref<112x128xf32, #tpu.memory_space<vmem>>, vector<64x1xf32>
    %c48_6 = arith.constant 48 : index
    %c2 = arith.constant 2 : index
    %7 = vector.load %arg3[%c48_6, %c2] : memref<112x128xf32, #tpu.memory_space<vmem>>, vector<32x1xf32>
    %c48_7 = arith.constant 48 : index
    %c3 = arith.constant 3 : index
    %8 = vector.load %arg3[%c48_7, %c3] : memref<112x128xf32, #tpu.memory_space<vmem>>, vector<16x1xf32>
    %c48_8 = arith.constant 48 : index
    %c4 = arith.constant 4 : index
    %9 = vector.load %arg3[%c48_8, %c4] : memref<112x128xf32, #tpu.memory_space<vmem>>, vector<16x1xf32>
    %c48_9 = arith.constant 48 : index
    %c5 = arith.constant 5 : index
    %10 = vector.load %arg3[%c48_9, %c5] : memref<112x128xf32, #tpu.memory_space<vmem>>, vector<1x1xf32>
    %c0_10 = arith.constant 0 : index
    %c0_11 = arith.constant 0 : index
    %c0_12 = arith.constant 0 : index
    %11 = vector.load %arg1[%c0_10, %c0_11, %c0_12] : memref<1x1x128xf32, #tpu.memory_space<vmem>>, vector<1x1x128xf32>
    %12 = vector.shape_cast %11 : vector<1x1x128xf32> to vector<1x128xf32>
    %13 = arith.truncf %12 : vector<1x128xf32> to vector<1x128xbf16>
    %cst = arith.constant dense<0.000000e+00> : vector<1x128xf32>
    %14 = tpu.matmul %13, %0, %cst {dimension_numbers = #tpu.dot_dimension_numbers<[1], [0], [0], [1], [0, 0, 1, 1], [], []>} : vector<1x128xbf16>, vector<128x128xbf16>, vector<1x128xf32> -> vector<1x128xf32>
    %15 = vector.broadcast %5 : vector<64x1xf32> to vector<64x128xf32>
    %16 = vector.broadcast %14 : vector<1x128xf32> to vector<64x128xf32>
    %17 = arith.mulf %15, %16 : vector<64x128xf32>
    %18 = vector.broadcast %6 : vector<64x1xf32> to vector<64x128xf32>
    %19 = arith.addf %17, %18 : vector<64x128xf32>
    %cst_13 = arith.constant 0.000000e+00 : f32
    %20 = vector.broadcast %cst_13 : f32 to vector<64x128xf32>
    %21 = arith.maximumf %19, %20 : vector<64x128xf32>
    %22 = arith.truncf %21 : vector<64x128xf32> to vector<64x128xbf16>
    %cst_14 = arith.constant dense<0.000000e+00> : vector<32x128xf32>
    %23 = tpu.matmul %2, %22, %cst_14 {dimension_numbers = #tpu.dot_dimension_numbers<[1], [0], [0], [1], [0, 0, 1, 1], [], []>} : vector<32x64xbf16>, vector<64x128xbf16>, vector<32x128xf32> -> vector<32x128xf32>
    %24 = arith.truncf %23 : vector<32x128xf32> to vector<32x128xbf16>
    %cst_15 = arith.constant dense<0.000000e+00> : vector<32x128xf32>
    %25 = tpu.matmul %24, %0, %cst_15 {dimension_numbers = #tpu.dot_dimension_numbers<[1], [0], [0], [1], [0, 0, 1, 1], [], []>} : vector<32x128xbf16>, vector<128x128xbf16>, vector<32x128xf32> -> vector<32x128xf32>
    %26 = vector.broadcast %7 : vector<32x1xf32> to vector<32x128xf32>
    %27 = arith.addf %25, %26 : vector<32x128xf32>
    %cst_16 = arith.constant 0.000000e+00 : f32
    %28 = vector.broadcast %cst_16 : f32 to vector<32x128xf32>
    %29 = arith.maximumf %27, %28 : vector<32x128xf32>
    %30 = arith.truncf %29 : vector<32x128xf32> to vector<32x128xbf16>
    %cst_17 = arith.constant dense<0.000000e+00> : vector<16x128xf32>
    %31 = tpu.matmul %4, %30, %cst_17 {dimension_numbers = #tpu.dot_dimension_numbers<[1], [0], [0], [1], [0, 0, 1, 1], [], []>} : vector<16x32xbf16>, vector<32x128xbf16>, vector<16x128xf32> -> vector<16x128xf32>
    %32 = arith.truncf %31 : vector<16x128xf32> to vector<16x128xbf16>
    %cst_18 = arith.constant dense<0.000000e+00> : vector<16x128xf32>
    %33 = tpu.matmul %32, %0, %cst_18 {dimension_numbers = #tpu.dot_dimension_numbers<[1], [0], [0], [1], [0, 0, 1, 1], [], []>} : vector<16x128xbf16>, vector<128x128xbf16>, vector<16x128xf32> -> vector<16x128xf32>
    %34 = vector.broadcast %8 : vector<16x1xf32> to vector<16x128xf32>
    %35 = arith.addf %33, %34 : vector<16x128xf32>
    %cst_19 = arith.constant 0.000000e+00 : f32
    %36 = vector.broadcast %cst_19 : f32 to vector<16x128xf32>
    %37 = arith.maximumf %35, %36 : vector<16x128xf32>
    %38 = arith.truncf %37 : vector<16x128xf32> to vector<16x128xbf16>
    %cst_20 = arith.constant dense<0.000000e+00> : vector<16x128xf32>
    %39 = tpu.matmul %38, %0, %cst_20 {dimension_numbers = #tpu.dot_dimension_numbers<[1], [0], [0], [1], [0, 0, 1, 1], [], []>} : vector<16x128xbf16>, vector<128x128xbf16>, vector<16x128xf32> -> vector<16x128xf32>
    %40 = vector.broadcast %9 : vector<16x1xf32> to vector<16x128xf32>
    %41 = arith.mulf %39, %40 : vector<16x128xf32>
    %cst_21 = arith.constant dense<0.000000e+00> : vector<128xf32>
    %42 = vector.multi_reduction <add>, %41, %cst_21 [0] : vector<16x128xf32> to vector<128xf32>
    %43 = vector.shape_cast %42 : vector<128xf32> to vector<1x128xf32>
    %44 = vector.broadcast %10 : vector<1x1xf32> to vector<1x128xf32>
    %45 = arith.addf %43, %44 : vector<1x128xf32>
    %c0_22 = arith.constant 0 : index
    %c0_23 = arith.constant 0 : index
    %c0_24 = arith.constant 0 : index
    %46 = vector.load %arg4[%c0_22, %c0_23, %c0_24] : memref<1x1x128xf32, #tpu.memory_space<vmem>>, vector<1x1x128xf32>
    %47 = vector.shape_cast %46 : vector<1x1x128xf32> to vector<1x128xf32>
    %48 = vector.shape_cast %45 : vector<1x128xf32> to vector<1x1x128xf32>
    tpu.vector_store %arg4[%c0_22, %c0_23, %c0_24], %48 {strides = array<i32>} : memref<1x1x128xf32, #tpu.memory_space<vmem>>, vector<1x1x128xf32>,
    return
  }
  func.func @transform_0(%arg0: i32) -> (i32, i32, i32) {
    %c0_i32 = arith.constant 0 : i32
    %c0_i32_0 = arith.constant 0 : i32
    %c0_i32_1 = arith.constant 0 : i32
    return %arg0, %c0_i32, %c0_i32_0 : i32, i32, i32
  }
  func.func @transform_1(%arg0: i32) -> (i32, i32) {
    %c0_i32 = arith.constant 0 : i32
    %c0_i32_0 = arith.constant 0 : i32
    %c0_i32_1 = arith.constant 0 : i32
    return %c0_i32, %c0_i32_0 : i32, i32
  }
  func.func @transform_2(%arg0: i32) -> (i32, i32) {
    %c0_i32 = arith.constant 0 : i32
    %c0_i32_0 = arith.constant 0 : i32
    %c0_i32_1 = arith.constant 0 : i32
    return %c0_i32, %c0_i32_0 : i32, i32
  }
  func.func @transform_3(%arg0: i32) -> (i32, i32, i32) {
    %c0_i32 = arith.constant 0 : i32
    %c0_i32_0 = arith.constant 0 : i32
    %c0_i32_1 = arith.constant 0 : i32
    return %arg0, %c0_i32, %c0_i32_0 : i32, i32, i32
  }
}

</mosaic_0001>

<bundles_post_ra>
// kernel: gnn_qlearning_forward_batched.1
= control target key start
LH: loop header
LB: loop body
LE: loop exit
PB: predicated region body
PF: predicated region fallthrough
CT: control target
= control target key end

     0   :  { %v738_v0 = vmov 0.0   ;;  %vm739_vm0 = vmmov 0   ;;  %v740_v2 = vmov 1   ;;  %v741_v10 = vmov 0   ;;  %s957_s1 = inlined_call_operand.vmem [shape: bf16[128,128], index: 1, kind: input, shape index: {}]   ;;  %s958_s2 = inlined_call_operand.vmem [shape: f32[112,128], index: 2, kind: input, shape index: {}]   ;;  %s959_s0 = inlined_call_operand.vmem [shape: f32[1,1,128], index: 0, kind: input, shape index: {}]   ;;  %s960_s3 = inlined_call_operand.vmem [shape: f32[1,1,128], index: 3, kind: output, shape index: {}]  }
   0x1   :  { %604 = vmatprep.subr.bf16.mxu0 %v738_v0  ;;  %v770_v1 = vld [vmem:[%s957_s1 + $0x38] sm:$0xff]   ;;  %620 = vmatprep.mubr.msk.bf16.mxu0 %vm739_vm0, %v738_v0  ;;  %v778_v3 = vld [vmem:[%s957_s1 + $0x30] sm:$0xff]   ;;  %v785_v4 = vld [vmem:[%s957_s1 + $0x28] sm:$0xff]   ;;  %vm247_vm1 = vcmask 523264   ;;  %v183_v33 = vlaneseq  ;;  %vm380_vm2 = vcmask 261120  }
   0x2   :  { %712 = vset.pattern.permute.xlu1 %v740_v2  ;;  %714 = vset.pattern.permute.xlu0 %v740_v2  ;;  %v46_v5 = vld [vmem:[%s958_s2 + $0x60] sm:$0xff]  ;;  %v44_v6 = vld [vmem:[%s958_s2 + $0x50] sm:$0xff]  ;;  %v47_v8 = vld [vmem:[%s958_s2 + $0x68] sm:$0xff] }
   0x3   :  { %605 = vmatpush3.bf16.msra.mxu0 %v770_v1  ;;  %220 = vperm.xlu1 %712, %v46_v5   ;;  %v798_v7 = vld [vmem:[%s957_s1 + $0x20] sm:$0xff]   ;;  %v808_v9 = vld [vmem:[%s957_s1 + $0x18] sm:$0xff]   ;;  %v818_v12 = vld [vmem:[%s957_s1 + $0x10] sm:$0xff]   ;;  %v184_v35 = vshrl.u32 %v183_v33, 7 }
   0x4   :  { %606 = vmatprep.subr.bf16.mxu0 %v738_v0  ;;  %212 = vperm.xlu0 %714, %v44_v6   ;;  %v45_v11 = vld [vmem:[%s958_s2 + $0x58] sm:$0xff]  ;;  %v825_v13 = vld [vmem:[%s957_s1 + $0x8] sm:$0xff]   ;;  %v831_v14 = vld [vmem:[%s958_s2 + $0x40] sm:$0xff] }
   0x5   :  { %v836_v15 = vld [vmem:[%s958_s2 + $0x48] sm:$0xff]  ;;  %v842_v16 = vld [vmem:[%s957_s1] sm:$0xff]   ;;  %v853_v19 = vld [vmem:[%s958_s2 + $0x30] sm:$0xff]  ;;  %v185_v37 = vsub.s32 0, %v184_v35 }
   0x6   :  { %v53_v17 = vld [vmem:[%s959_s0] sm:$0x1]  ;;  %v866_v20 = vld [vmem:[%s958_s2 + $0x38] sm:$0xff]  ;;  %v32_v22 = vld [vmem:[%s958_s2 + $0x8] sm:$0xff] }
   0x7   :  { %607 = vmatpush3.bf16.msra.mxu0 %v778_v3  ;;  %224 = vperm.xlu1 %712, %v47_v8   ;;  %v54_v18 = vpack.c.bf16 %v53_v17, %v53_v17  ;;  %v31_v21 = vld [vmem:[%s958_s2] sm:$0xff] }
   0x8   :  { %608 = vmatprep.subr.bf16.mxu0 %v738_v0  ;;  %715 = vset.pattern.permute.xlu0 %v741_v10  ;;  %v35_v23 = vpack.c.bf16 %v32_v22, %v31_v21 }
   0x9   :  { %175 = vperm.xlu0 %715, %v46_v5  }
   0xa   :  { %632 = vmatprep.mubr.msk.bf16.mxu1 %vm247_vm1, %v35_v23 }
   0xb   :  { %609 = vmatpush3.bf16.msra.mxu0 %v785_v4  ;;  %713 = vset.pattern.permute.xlu1 %v741_v10 }
   0xc   :  { %610 = vmatprep.subr.bf16.mxu0 %v738_v0  ;;  %170 = vperm.xlu1 %713, %v45_v11  }
   0xd   :  { %180 = vperm.xlu0 %715, %v47_v8  }
   0xf   :  { %611 = vmatpush3.bf16.msra.mxu0 %v798_v7 }
  0x10   :  { %612 = vmatprep.subr.bf16.mxu0 %v738_v0  ;;  %716 = vset.pattern.permute.xlu1 %v740_v2 }
  0x11   :  { %216 = vperm.xlu1 %716, %v45_v11   ;;  %165 = vperm.xlu0 %715, %v44_v6  }
  0x13   :  { %613 = vmatpush3.bf16.msra.mxu0 %v808_v9 }
  0x14   :  { %614 = vmatprep.subr.bf16.mxu0 %v738_v0 }
  0x15   :  { %717 = vset.pattern.permute.xlu1 %v741_v10  ;;  %160 = vperm.xlu0 %715, %v836_v15  }
  0x16   :  { %155 = vperm.xlu1 %717, %v831_v14  }
  0x17   :  { %615 = vmatpush3.bf16.msra.mxu0 %v818_v12 }
  0x18   :  { %616 = vmatprep.subr.bf16.mxu0 %v738_v0 }
  0x19   :  { %145 = vperm.xlu0 %715, %v853_v19  }
  0x1a   :  { %718 = vset.pattern.permute.xlu1 %v740_v2 }
  0x1b   :  { %617 = vmatpush3.bf16.msra.mxu0 %v825_v13  ;;  %204 = vperm.xlu1 %718, %v831_v14  }
  0x1c   :  { %618 = vmatprep.subr.bf16.mxu0 %v738_v0 }
  0x1d   :  { %720 = vset.pattern.permute.xlu0 %v740_v2 }
  0x1e   :  { %196 = vperm.xlu0 %720, %v853_v19  }
  0x1f   :  { %619 = vmatpush3.bf16.msra.mxu0 %v842_v16  ;;  %208 = vperm.xlu1 %718, %v836_v15  }
  0x20   :  { %656 = vmatprep.subr.bf16.mxu0 %v738_v0 }
  0x22   :  { %621 = vmatmul.mubr.bf16.vlgmr.msra.gmra.mxu0 %v54_v18 }
  0x23   :  { %660 = vmatprep.mubr.msk.bf16.mxu0 %vm739_vm0, %v738_v0  ;;  %719 = vset.pattern.permute.xlu1 %v741_v10 }
  0x24   :  { %150 = vperm.xlu1 %719, %v866_v20  }
  0x28   :  { %721 = vset.pattern.permute.xlu1 %v740_v2 }
  0x29   :  { %200 = vperm.xlu1 %721, %v866_v20  }
  0x7e   :  { %v221_v24 = vpop.permute.xlu1 %220 }
  0x7f   :  { %v213_v27 = vpop.permute.xlu0 %212 }
  0x82   :  { %v225_v25 = vpop.permute.xlu1 %224 }
  0x84   :  { %v176_v29 = vpop.permute.xlu0 %175 }
  0x87   :  { %v171_v26 = vpop.permute.xlu1 %170 }
  0x88   :  { %v181_v31 = vpop.permute.xlu0 %180 }
  0x8c   :  { %v217_v28 = vpop.permute.xlu1 %216  ;;  %v166_v34 = vpop.permute.xlu0 %165 }
  0x90   :  { %v161_v38 = vpop.permute.xlu0 %160 }
  0x91   :  { %v156_v30 = vpop.permute.xlu1 %155 }
  0x94   :  { %v146_v45 = vpop.permute.xlu0 %145 }
  0x96   :  { %v205_v32 = vpop.permute.xlu1 %204 }
  0x99   :  { %v197_v63 = vpop.permute.xlu0 %196 }
  0x9a   :  { %v209_v36 = vpop.permute.xlu1 %208 }
  0x9f   :  { %v151_v40 = vpop.permute.xlu1 %150 }
  0xa4   :  { %v201_v58 = vpop.permute.xlu1 %200 }
  0xe2   :  { %v137_v39 = vpop.f32.mrf.mxu0 }
  0xe3   :  { %v186_v41 = vrot.slane %v137_v39, %v185_v37 }
  0xe4   :  { %v622_v42 = vpop.f32.mrf.mxu0 }
  0xe5   :  { %v193_v43 = vmul.f32 %v186_v41, %v176_v29  ;;  %v194_v44 = vmul.f32 %v186_v41, %v181_v31  ;;  %v191_v47 = vmul.f32 %v186_v41, %v166_v34  ;;  %v192_v48 = vmul.f32 %v186_v41, %v171_v26  ;;  %v34_v26 = vld [vmem:[%s958_s2 + $0x18] sm:$0xff] }
  0xe6   :  { %v140_v46 = vpop.f32.mrf.mxu0  ;;  %v189_v49 = vmul.f32 %v186_v41, %v156_v30  ;;  %v190_v50 = vmul.f32 %v186_v41, %v161_v38  ;;  %v188_v53 = vmul.f32 %v186_v41, %v151_v40  ;;  %v187_v54 = vmul.f32 %v186_v41, %v146_v45 }
  0xe7   :  { %v233_v51 = vadd.f32 %v221_v24, %v193_v43  ;;  %v234_v52 = vadd.f32 %v225_v25, %v194_v44  ;;  %v231_v56 = vadd.f32 %v213_v27, %v191_v47  ;;  %v232_v57 = vadd.f32 %v217_v28, %v192_v48  ;;  %v33_v25 = vld [vmem:[%s958_s2 + $0x10] sm:$0xff] }
  0xe8   :  { %v623_v55 = vpop.f32.mrf.mxu0  ;;  %v229_v61 = vadd.f32 %v205_v32, %v189_v49  ;;  %v230_v62 = vadd.f32 %v209_v36, %v190_v50  ;;  %v228_v8 = vadd.f32 %v201_v58, %v188_v53  ;;  %v227_v10 = vadd.f32 %v197_v63, %v187_v54  ;;  %v37_v50 = vld [vmem:[%s958_s2 + $0x20] sm:$0xff] }
  0xe9   :  { %v241_v59 = vmax.f32 %v233_v51, 0.0  ;;  %v242_v60 = vmax.f32 %v234_v52, 0.0  ;;  %v239_v2 = vmax.f32 %v231_v56, 0.0  ;;  %v240_v5 = vmax.f32 %v232_v57, 0.0  ;;  %v38_v51 = vld [vmem:[%s958_s2 + $0x28] sm:$0xff] }
  0xea   :  { %v237_v17 = vmax.f32 %v229_v61, 0.0  ;;  %v238_v18 = vmax.f32 %v230_v62, 0.0  ;;  %v236_v21 = vmax.f32 %v228_v8, 0.0  ;;  %v235_v22 = vmax.f32 %v227_v10, 0.0 }
  0xeb   :  { %v246_v6 = vpack.c.bf16 %v242_v60, %v241_v59  ;;  %v245_v11 = vpack.c.bf16 %v240_v5, %v239_v2  ;;  %v36_v27 = vpack.c.bf16 %v34_v26, %v33_v25  ;;  %v742_v28 = vmov 2  }
  0xec   :  { %v244_v23 = vpack.c.bf16 %v238_v18, %v237_v17  ;;  %v243_v24 = vpack.c.bf16 %v236_v21, %v235_v22  ;;  %722 = vset.pattern.permute.xlu1 %v742_v28  ;;  %723 = vset.pattern.permute.xlu0 %v742_v28  ;;  %v39_v53 = vpack.c.bf16 %v38_v51, %v37_v50  ;;  %v744_v54 = vmov 4  }
  0xed   :  { %624 = vmatprep.subr.bf16.mxu1 %v246_v6  ;;  %317 = vperm.xlu1 %722, %v831_v14  }
  0xee   :  { %625 = vmatpush3.bf16.msra.mxu1 %v246_v6  ;;  %322 = vperm.xlu0 %723, %v836_v15  }
  0xef   :  { %626 = vmatprep.subr.bf16.mxu1 %v245_v11 }
  0xf1   :  { %307 = vperm.xlu1 %722, %v853_v19  }
  0xf2   :  { %627 = vmatpush3.bf16.msra.mxu1 %v245_v11 }
  0xf3   :  { %628 = vmatprep.subr.bf16.mxu1 %v244_v23 }
  0xf5   :  { %312 = vperm.xlu1 %722, %v866_v20  }
  0xf6   :  { %629 = vmatpush3.bf16.msra.mxu1 %v244_v23 }
  0xf7   :  { %630 = vmatprep.subr.bf16.mxu1 %v243_v24 }
  0xfa   :  { %631 = vmatpush3.bf16.msra.mxu1 %v243_v24 }
  0xfb   :  { %636 = vmatprep.subr.bf16.mxu1 %v770_v1 }
  0xfd   :  { %633 = vmatmul.mubr.msk.bf16.vlgmr.msra.gmra.mxu1 %vm247_vm1, %v36_v27 }
  0xfe   :  { %637 = vmatpush3.bf16.msra.mxu1 %v770_v1 }
  0xff   :  { %638 = vmatprep.subr.bf16.mxu1 %v778_v3 }
 0x102   :  { %639 = vmatpush3.bf16.msra.mxu1 %v778_v3 }
 0x103   :  { %640 = vmatprep.subr.bf16.mxu1 %v785_v4 }
 0x106   :  { %641 = vmatpush3.bf16.msra.mxu1 %v785_v4 }
 0x107   :  { %642 = vmatprep.subr.bf16.mxu1 %v798_v7 }
 0x10a   :  { %643 = vmatpush3.bf16.msra.mxu1 %v798_v7 }
 0x10b   :  { %644 = vmatprep.subr.bf16.mxu1 %v808_v9 }
 0x10e   :  { %645 = vmatpush3.bf16.msra.mxu1 %v808_v9 }
 0x10f   :  { %646 = vmatprep.subr.bf16.mxu1 %v818_v12 }
 0x112   :  { %647 = vmatpush3.bf16.msra.mxu1 %v818_v12 }
 0x113   :  { %648 = vmatprep.subr.bf16.mxu1 %v825_v13 }
 0x116   :  { %649 = vmatpush3.bf16.msra.mxu1 %v825_v13 }
 0x117   :  { %650 = vmatprep.subr.bf16.mxu1 %v842_v16 }
 0x11a   :  { %651 = vmatpush3.bf16.msra.mxu1 %v842_v16 }
 0x11b   :  { %684 = vmatprep.subr.bf16.mxu1 %v738_v0 }
 0x168   :  { %v318_v14 = vpop.permute.xlu1 %317 }
 0x169   :  { %v323_v37 = vpop.permute.xlu0 %322 }
 0x16c   :  { %v308_v15 = vpop.permute.xlu1 %307 }
 0x170   :  { %v313_v41 = vpop.permute.xlu1 %312 }
 0x1bd   :  { %v634_v29 = vpop.f32.mrf.mxu1 }
 0x1bf   :  { %v288_v30 = vpop.f32.mrf.mxu1 }
 0x1c1   :  { %v635_v31 = vpop.f32.mrf.mxu1 }
 0x1c2   :  { %v304_v34 = vpack.c.bf16 %v635_v31, %v634_v29 }
 0x1c3   :  { %v291_v32 = vpop.f32.mrf.mxu1 }
 0x1c4   :  { %v303_v33 = vpack.c.bf16 %v291_v32, %v288_v30 }
 0x1c6   :  { %652 = vmatprep.mubr.bf16.mxu1 %v303_v33 }
 0x1c7   :  { %653 = vmatmul.mubr.bf16.vlgmr.msra.gmra.mxu1 %v304_v34 }
 0x1c8   :  { %685 = vmatpush3.bf16.msra.mxu1 %v770_v1  ;;  %700 = vmatprep.mubr.msk.bf16.mxu1 %vm739_vm0, %v738_v0 }
 0x1c9   :  { %686 = vmatprep.subr.bf16.mxu1 %v738_v0 }
 0x1cc   :  { %687 = vmatpush3.bf16.msra.mxu1 %v778_v3 }
 0x1cd   :  { %688 = vmatprep.subr.bf16.mxu1 %v738_v0 }
 0x1d0   :  { %689 = vmatpush3.bf16.msra.mxu1 %v785_v4 }
 0x1d1   :  { %690 = vmatprep.subr.bf16.mxu1 %v738_v0 }
 0x1d4   :  { %691 = vmatpush3.bf16.msra.mxu1 %v798_v7 }
 0x1d5   :  { %692 = vmatprep.subr.bf16.mxu1 %v738_v0 }
 0x1d8   :  { %693 = vmatpush3.bf16.msra.mxu1 %v808_v9 }
 0x1d9   :  { %694 = vmatprep.subr.bf16.mxu1 %v738_v0 }
 0x1dc   :  { %695 = vmatpush3.bf16.msra.mxu1 %v818_v12 }
 0x1dd   :  { %696 = vmatprep.subr.bf16.mxu1 %v738_v0 }
 0x1e0   :  { %697 = vmatpush3.bf16.msra.mxu1 %v825_v13 }
 0x1e1   :  { %698 = vmatprep.subr.bf16.mxu1 %v738_v0 }
 0x1e4   :  { %699 = vmatpush3.bf16.msra.mxu1 %v842_v16 }
 0x287   :  { %v654_v35 = vpop.f32.mrf.mxu1 }
 0x288   :  { %v368_v38 = vadd.f32 %v654_v35, %v318_v14 }
 0x289   :  { %v359_v36 = vpop.f32.mrf.mxu1 }
 0x28a   :  { %v376_v43 = vmax.f32 %v368_v38, 0.0  ;;  %v360_v44 = vadd.f32 %v359_v36, %v308_v15 }
 0x28b   :  { %v655_v39 = vpop.f32.mrf.mxu1 }
 0x28c   :  { %v371_v40 = vadd.f32 %v655_v39, %v323_v37  ;;  %v374_v49 = vmax.f32 %v360_v44, 0.0 }
 0x28d   :  { %v362_v42 = vpop.f32.mrf.mxu1 }
 0x28e   :  { %v377_v45 = vmax.f32 %v371_v40, 0.0  ;;  %v363_v46 = vadd.f32 %v362_v42, %v313_v41 }
 0x290   :  { %v379_v47 = vpack.c.bf16 %v377_v45, %v376_v43  ;;  %v375_v48 = vmax.f32 %v363_v46, 0.0 }
 0x292   :  { %657 = vmatpush3.bf16.msra.mxu0 %v379_v47  ;;  %v378_v52 = vpack.c.bf16 %v375_v48, %v374_v49 }
 0x293   :  { %658 = vmatprep.subr.bf16.mxu0 %v738_v0 }
 0x296   :  { %659 = vmatpush3.bf16.msra.mxu0 %v378_v52 }
 0x297   :  { %664 = vmatprep.subr.bf16.mxu0 %v738_v0 }
 0x299   :  { %661 = vmatmul.mubr.msk.bf16.vlgmr.msra.gmra.mxu0 %vm380_vm2, %v39_v53 }
 0x29a   :  { %665 = vmatpush3.bf16.msra.mxu0 %v770_v1  ;;  %680 = vmatprep.mubr.msk.bf16.mxu0 %vm739_vm0, %v738_v0  ;;  %v743_v1 = vmov 3  }
 0x29b   :  { %666 = vmatprep.subr.bf16.mxu0 %v738_v0  ;;  %724 = vset.pattern.permute.xlu0 %v743_v1 }
 0x29c   :  { %725 = vset.pattern.permute.xlu1 %v743_v1  ;;  %427 = vperm.xlu0 %724, %v853_v19  }
 0x29d   :  { %431 = vperm.xlu1 %725, %v866_v20  }
 0x29e   :  { %667 = vmatpush3.bf16.msra.mxu0 %v778_v3 }
 0x29f   :  { %668 = vmatprep.subr.bf16.mxu0 %v738_v0 }
 0x2a0   :  { %727 = vset.pattern.permute.xlu0 %v744_v54 }
 0x2a1   :  { %726 = vset.pattern.permute.xlu1 %v744_v54  ;;  %524 = vperm.xlu0 %727, %v866_v20  }
 0x2a2   :  { %669 = vmatpush3.bf16.msra.mxu0 %v785_v4  ;;  %520 = vperm.xlu1 %726, %v853_v19  }
 0x2a3   :  { %670 = vmatprep.subr.bf16.mxu0 %v738_v0 }
 0x2a6   :  { %671 = vmatpush3.bf16.msra.mxu0 %v798_v7 }
 0x2a7   :  { %672 = vmatprep.subr.bf16.mxu0 %v738_v0 }
 0x2aa   :  { %673 = vmatpush3.bf16.msra.mxu0 %v808_v9 }
 0x2ab   :  { %674 = vmatprep.subr.bf16.mxu0 %v738_v0 }
 0x2ae   :  { %675 = vmatpush3.bf16.msra.mxu0 %v818_v12 }
 0x2af   :  { %676 = vmatprep.subr.bf16.mxu0 %v738_v0 }
 0x2b2   :  { %677 = vmatpush3.bf16.msra.mxu0 %v825_v13  ;;  %v745_v13 = vmov 5  }
 0x2b3   :  { %678 = vmatprep.subr.bf16.mxu0 %v738_v0  ;;  %v52_v0 = vld [vmem:[%s958_s2 + $0x30] sm:$0x1]  ;;  %728 = vset.pattern.permute.xlu1 %v745_v13 }
 0x2b4   :  { %729 = vset.pattern.permute.xlu0 %v745_v13  ;;  %538 = vperm.xlu1 %728, %v52_v0  }
 0x2b6   :  { %679 = vmatpush3.bf16.msra.mxu0 %v842_v16 }
 0x317   :  { %v428_v16 = vpop.permute.xlu0 %427 }
 0x318   :  { %v432_v57 = vpop.permute.xlu1 %431 }
 0x31c   :  { %v525_v6 = vpop.permute.xlu0 %524 }
 0x31d   :  { %v521_v2 = vpop.permute.xlu1 %520 }
 0x32f   :  { %v539_v26 = vpop.permute.xlu1 %538 }
 0x359   :  { %v418_v3 = vpop.f32.mrf.mxu0 }
 0x35b   :  { %v662_v4 = vpop.f32.mrf.mxu0 }
 0x35d   :  { %v421_v7 = vpop.f32.mrf.mxu0 }
 0x35e   :  { %v425_v9 = vpack.c.bf16 %v421_v7, %v418_v3 }
 0x35f   :  { %v663_v12 = vpop.f32.mrf.mxu0 }
 0x360   :  { %681 = vmatmul.mubr.bf16.vlgmr.msra.gmra.mxu0 %v425_v9 }
 0x420   :  { %v468_v55 = vpop.f32.mrf.mxu0 }
 0x421   :  { %v469_v58 = vadd.f32 %v468_v55, %v428_v16 }
 0x422   :  { %v682_v56 = vpop.f32.mrf.mxu0 }
 0x423   :  { %v475_v62 = vmax.f32 %v469_v58, 0.0 }
 0x424   :  { %v471_v59 = vpop.f32.mrf.mxu0 }
 0x425   :  { %v472_v60 = vadd.f32 %v471_v59, %v432_v57 }
 0x426   :  { %v683_v61 = vpop.f32.mrf.mxu0 }
 0x427   :  { %v476_v19 = vmax.f32 %v472_v60, 0.0 }
 0x429   :  { %v477_v63 = vpack.c.bf16 %v476_v19, %v475_v62 }
 0x42b   :  { %701 = vmatmul.mubr.bf16.vlgmr.msra.gmra.mxu1 %v477_v63 }
 0x4eb   :  { %v512_v20 = vpop.f32.mrf.mxu1 }
 0x4ec   :  { %v527_v10 = vmul.f32 %v521_v2, %v512_v20 }
 0x4ed   :  { %v702_v5 = vpop.f32.mrf.mxu1 }
 0x4ef   :  { %v515_v8 = vpop.f32.mrf.mxu1 }
 0x4f0   :  { %v528_v11 = vmul.f32 %v525_v6, %v515_v8 }
 0x4f1   :  { %v703_v17 = vpop.f32.mrf.mxu1 }
 0x4f2   :  { %v529_v18 = vadd.f32 %v528_v11, %v527_v10 }
 0x4f4   :  { %v530_v21 = vrot.slane %v529_v18, 4 }
 0x4f6   :  { %v531_v22 = vadd.f32 %v530_v21, %v529_v18 }
 0x4f8   :  { %v532_v23 = vrot.slane %v531_v22, 2 }
 0x4fa   :  { %v533_v24 = vadd.f32 %v532_v23, %v531_v22 }
 0x4fc   :  { %v534_v25 = vrot.slane %v533_v24, 1 }
 0x4fe   :  { %v535_v27 = vadd.f32 %v534_v25, %v533_v24 }
 0x500   :  { %v541_v28 = vadd.f32 %v539_v26, %v535_v27 }
 0x502   :  { %542 = vst [vmem:[%s960_s3] sm:$0x1] %v541_v28 }

</bundles_post_ra>
